<compile_context>
chip_gen: v7x
topology: tpu7x:2x2x1
jax: 0.10.0
libtpu: 0.0.40
codegen_flags: <defaults>
</compile_context>

<pallas_src>
import jax
import jax.numpy as jnp
from jax.experimental import pallas as pl
from jax.experimental.pallas import tpu as pltpu

# ---------------- synthetic config (config-driven in the original module) ----
B, C_IN, H, W = 2, 4, 12, 12      # input image (small)
FEAT = 32                         # synthetic backbone feature width
K = 8                             # num_classes_classification
R = 4                             # num_classes_rot
PATCH = 3                         # diversification_block patch_size (H % PATCH == 0)
ALPHA = 0.1                       # diversification suppression factor
P_PEAK = 0.5
P_PATCH = 0.3
S = H * W                         # 144 spatial positions -> LANES
POOL_OUT = 3                      # AdaptiveAvgPool2d(3); H, W divisible by 3
NBIN = POOL_OUT * POOL_OUT        # 9
NP = (H // PATCH) * (W // PATCH)  # 16 patches per map
KR = K * R                        # 32
BC = B * C_IN                     # 8
BF = B * FEAT                     # 64
BK = B * K                        # 16


# ------------------------------ fused kernels --------------------------------
def _stem(x, w1b1, w2b2):
    # Synthetic backbone stem (1x1 conv + ReLU) and CAM 1x1 conv, spatial in lanes.
    # Block-diagonal transposed weights handle both batches in one matmul each.
    h = jnp.dot(w1b1[:, :BC], x, preferred_element_type=jnp.float32) + w1b1[:, BC:BC + 1]
    h = jnp.maximum(h, 0.0)
    cam = jnp.dot(w2b2[:, :BF], h, preferred_element_type=jnp.float32) + w2b2[:, BF:BF + 1]
    return cam                                                   # (B*K, S)


def _eval_kernel(x_ref, w1b1_ref, w2b2_ref, meanmask_ref, selb_ref, o_ref):
    cam = _stem(x_ref[...], w1b1_ref[...], w2b2_ref[...])        # (B*K, S)
    mm = meanmask_ref[...]                                       # rows 0:S mean cols, S: rep-mask
    # spatial mean as a matmul; mask keeps only the (b,k)-diagonal entry per row
    u = jnp.dot(cam, mm[:S, :], preferred_element_type=jnp.float32) * mm[S:, :]   # (B*K, K)
    # one full-tile store
    o_ref[...] = jnp.dot(selb_ref[...], u, preferred_element_type=jnp.float32)    # (B, K)


def _train_kernel(x_ref, rand_ref, w1b1_ref, w2b2_ref, epatch_ref, wmask_ref,
                  postb_ref, selb_ref, o_ref):
    cam = _stem(x_ref[...], w1b1_ref[...], w2b2_ref[...])        # (B*K, S)

    # --- DiversificationBlock: peak + patch suppression, factor ALPHA ---------
    rand = rand_ref[...]                                         # (B*K, 1+NP) Bernoulli draws
    peak_draw = rand[:, 0:1]                                     # (B*K, 1)   p_peak per (b,k)
    patch_pix = jnp.dot(rand[:, 1:1 + NP], epatch_ref[...],
                        preferred_element_type=jnp.float32)      # (B*K, S)   p_patch per patch
    # TODO(synk): peak mask uses exact float equality (ties select multiple peaks),
    # matching the previous reference implementation.
    pmax = jnp.max(cam, axis=1, keepdims=True)                   # (B*K, 1) lane-max (XLU)
    mask = jnp.where(cam == pmax, peak_draw, patch_pix)          # (B*K, S)
    supp = cam * jnp.where(mask > 0.0, jnp.float32(ALPHA), jnp.float32(1.0))

    # --- classification + rotation heads in one batched pipeline --------------
    wm = wmask_ref[...]                                          # rows 0:S Wcat, S: MaskCat
    # single matmul contracting over S=144 covers both the spatial mean and the
    # pre-folded AdaptiveAvgPool2d(3)+Flatten+Linear rotation head
    u = jnp.dot(supp, wm[:S, :], preferred_element_type=jnp.float32) * wm[S:, :]  # (B*K, K+KR)
    pb = postb_ref[...]                                          # rows 0:K+KR PostMat, last bias
    v = jnp.dot(u, pb[:K + KR, :], preferred_element_type=jnp.float32)            # (B*K, K+R)
    # single full-tile store: [:, :K] = y_classification, [:, K:] = y_rotation
    o_ref[...] = (jnp.dot(selb_ref[...], v, preferred_element_type=jnp.float32)
                  + pb[K + KR:, :])                              # (B, K+R)


# ------------------------------- pallas_call wrappers -------------------------
def _vmem():
    return pl.BlockSpec(memory_space=pltpu.MemorySpace.VMEM)


_EVAL_COST = pl.CostEstimate(
    flops=2 * (BF * BC * S + BK * BF * S + BK * S * K + B * BK * K),
    transcendentals=0,
    bytes_accessed=4 * (BC * S + BF * (BC + 1) + BK * (BF + 1) + (S + BK) * K
                        + B * BK + B * K),
)

_TRAIN_COST = pl.CostEstimate(
    flops=2 * (BF * BC * S + BK * BF * S + BK * NP * S + BK * S * (K + KR)
               + BK * (K + KR) * (K + R) + B * BK * (K + R)),
    transcendentals=0,
    bytes_accessed=4 * (BC * S + BK * (1 + NP) + BF * (BC + 1) + BK * (BF + 1)
                        + NP * S + (S + BK) * (K + KR) + (K + KR + 1) * (K + R)
                        + B * BK + B * (K + R)),
)


def _eval_call(params, x_flat):
    return pl.pallas_call(
        _eval_kernel,
        out_shape=jax.ShapeDtypeStruct((B, K), jnp.float32),
        in_specs=[_vmem() for _ in range(5)],
        out_specs=_vmem(),
        cost_estimate=_EVAL_COST,
    )(x_flat, params["w1b1"], params["w2b2"], params["meanmask"], params["selb"])


def _train_call(params, x_flat, rand):
    return pl.pallas_call(
        _train_kernel,
        out_shape=jax.ShapeDtypeStruct((B, K + R), jnp.float32),
        in_specs=[_vmem() for _ in range(8)],
        out_specs=_vmem(),
        cost_estimate=_TRAIN_COST,
    )(x_flat, rand, params["w1b1"], params["w2b2"], params["e_patch_t"],
      params["wmask"], params["postb"], params["selb"])


# ------------------------------- params / constants ---------------------------
def init_params(key):
    k1, k2, k3, k4, k5, k6 = jax.random.split(key, 6)
    # "module" parameters
    w1 = jax.random.normal(k1, (C_IN, FEAT), jnp.float32) * 0.1   # stem 1x1 conv
    b1 = jax.random.normal(k2, (FEAT,), jnp.float32) * 0.01
    w2 = jax.random.normal(k3, (FEAT, K), jnp.float32) * 0.1      # CAM 1x1 conv
    b2 = jax.random.normal(k4, (K,), jnp.float32) * 0.01
    wr = jax.random.normal(k5, (K * NBIN, R), jnp.float32) * 0.1  # rotation_head.weight.T
    br = jax.random.normal(k6, (R,), jnp.float32) * 0.01          # rotation_head.bias

    eye_b = jnp.eye(B, dtype=jnp.float32)

    # Block-diagonal transposed stem weights (+ bias column) for spatial-in-lanes.
    w1b1 = jnp.concatenate([jnp.kron(eye_b, w1.T),
                            jnp.tile(b1[:, None], (B, 1))], axis=1)      # (B*FEAT, B*C_IN+1)
    w2b2 = jnp.concatenate([jnp.kron(eye_b, w2.T),
                            jnp.tile(b2[:, None], (B, 1))], axis=1)      # (B*K, B*FEAT+1)

    hh = jnp.arange(S) // W
    ww = jnp.arange(S) % W

    # Patch expansion (NP, S): per-patch Bernoulli -> per-pixel via one matmul.
    pidx = (hh // PATCH) * (W // PATCH) + (ww // PATCH)
    e_patch_t = (pidx[None, :] == jnp.arange(NP)[:, None]).astype(jnp.float32)

    # AdaptiveAvgPool2d(3) averaging matrix (S, NBIN), divisible case.
    bidx = (hh // (H // POOL_OUT)) * POOL_OUT + (ww // (W // POOL_OUT))
    pool = ((bidx[:, None] == jnp.arange(NBIN)[None, :]).astype(jnp.float32)
            / float((H // POOL_OUT) * (W // POOL_OUT)))

    # Pre-fold pool + k-major Flatten + Linear: Wrot[s, k*R+r] = sum_bin pool[s,bin]*wr[k*NBIN+bin,r]
    wrot = jnp.einsum("sn,knr->skr", pool, wr.reshape(K, NBIN, R)).reshape(S, KR)
    mean_exp = jnp.full((S, K), 1.0 / S, jnp.float32)                    # spatial mean columns
    wcat = jnp.concatenate([mean_exp, wrot], axis=1)                     # (S, K+KR)

    # Row/class selection masks: keep only class k == (row m) mod K.
    m_idx = jnp.arange(BK)
    rep_mask = (m_idx[:, None] % K == jnp.arange(K)[None, :]).astype(jnp.float32)  # (B*K, K)
    maskcat = jnp.concatenate([rep_mask, jnp.repeat(rep_mask, R, axis=1)], axis=1)  # (B*K, K+KR)

    wmask = jnp.concatenate([wcat, maskcat], axis=0)                     # (S+B*K, K+KR)
    meanmask = jnp.concatenate([mean_exp, rep_mask], axis=0)             # (S+B*K, K)

    # PostMat: identity on the K classification columns, sum-over-k on rotation columns.
    post = jnp.zeros((K + KR, K + R), jnp.float32)
    post = post.at[:K, :K].set(jnp.eye(K, dtype=jnp.float32))
    post = post.at[K:, K:].set(jnp.tile(jnp.eye(R, dtype=jnp.float32), (K, 1)))
    bias_row = jnp.concatenate([jnp.zeros((1, K), jnp.float32), br[None, :]], axis=1)
    postb = jnp.concatenate([post, bias_row], axis=0)                    # (K+KR+1, K+R)

    # Per-batch row-sum selector (B, B*K).
    selb = jnp.kron(eye_b, jnp.ones((1, K), jnp.float32))

    return dict(w1b1=w1b1, w2b2=w2b2, e_patch_t=e_patch_t, wmask=wmask,
                meanmask=meanmask, postb=postb, selb=selb)


# ------------------------------------ forward --------------------------------
def fgvc_ssl_rotation_forward(params, x, rng, train=False):
    # NCHW -> (B*C_IN, S): plain reshape (no transpose); spatial goes to lanes.
    x_flat = x.reshape(BC, S)
    if not train:
        return _eval_call(params, x_flat)                        # y_classification

    # Single tiny Bernoulli draw: col 0 = peak mask (p_peak) per (b, class),
    # cols 1..NP = per-patch mask (p_patch) per (b, class, patch); expanded in-kernel.
    p_cols = jnp.concatenate([jnp.full((1,), P_PEAK, jnp.float32),
                              jnp.full((NP,), P_PATCH, jnp.float32)])
    rand = jax.random.bernoulli(rng, p_cols, (BK, 1 + NP)).astype(jnp.float32)

    out = _train_call(params, x_flat, rand)                      # (B, K+R)
    return out[:, :K], out[:, K:]                                # (y_classification, y_rotation)


if __name__ == "__main__":
    key = jax.random.PRNGKey(0)
    pkey, xkey, mkey = jax.random.split(key, 3)
    params = init_params(pkey)
    x = jax.random.normal(xkey, (B, C_IN, H, W), jnp.float32)

    y_cls_eval = fgvc_ssl_rotation_forward(params, x, mkey, train=False)
    y_cls_tr, y_rot_tr = fgvc_ssl_rotation_forward(params, x, mkey, train=True)
    jax.block_until_ready((y_cls_eval, y_cls_tr, y_rot_tr))

    assert y_cls_eval.shape == (B, K)
    assert y_cls_tr.shape == (B, K)
    assert y_rot_tr.shape == (B, R)
    print("KERNEL_OK")
</pallas_src>

<mosaic_0001>
module attributes {stable_mosaic.version = 11 : i64} {
  func.func @_eval_kernel(%arg0: memref<8x144xf32, #tpu.memory_space<vmem>>, %arg1: memref<64x9xf32, #tpu.memory_space<vmem>>, %arg2: memref<16x65xf32, #tpu.memory_space<vmem>>, %arg3: memref<160x8xf32, #tpu.memory_space<vmem>>, %arg4: memref<2x16xf32, #tpu.memory_space<vmem>>, %arg5: memref<2x8xf32, #tpu.memory_space<vmem>>) attributes {dimension_semantics = [], scalar_prefetch = 0 : i64, scratch_operands = 0 : i64, tpu.core_type = #tpu.core_type<tc>} {
    %c0 = arith.constant 0 : index
    %c0_0 = arith.constant 0 : index
    %0 = vector.load %arg0[%c0, %c0_0] : memref<8x144xf32, #tpu.memory_space<vmem>>, vector<8x144xf32>
    %c0_1 = arith.constant 0 : index
    %c0_2 = arith.constant 0 : index
    %1 = vector.load %arg1[%c0_1, %c0_2] : memref<64x9xf32, #tpu.memory_space<vmem>>, vector<64x9xf32>
    %c0_3 = arith.constant 0 : index
    %c0_4 = arith.constant 0 : index
    %2 = vector.load %arg2[%c0_3, %c0_4] : memref<16x65xf32, #tpu.memory_space<vmem>>, vector<16x65xf32>
    %3 = vector.extract_strided_slice %1 {offsets = [0, 0], sizes = [64, 8], strides = [1, 1]} : vector<64x9xf32> to vector<64x8xf32>
    %cst = arith.constant dense<0.000000e+00> : vector<64x144xf32>
    %4 = tpu.matmul %3, %0, %cst {dimension_numbers = #tpu.dot_dimension_numbers<[1], [0], [0], [1], [0, 0, 1, 1], [], []>} : vector<64x8xf32>, vector<8x144xf32>, vector<64x144xf32> -> vector<64x144xf32>
    %5 = vector.extract_strided_slice %1 {offsets = [0, 8], sizes = [64, 1], strides = [1, 1]} : vector<64x9xf32> to vector<64x1xf32>
    %6 = vector.broadcast %5 : vector<64x1xf32> to vector<64x144xf32>
    %7 = arith.addf %4, %6 : vector<64x144xf32>
    %cst_5 = arith.constant 0.000000e+00 : f32
    %8 = vector.broadcast %cst_5 : f32 to vector<64x144xf32>
    %9 = arith.maximumf %7, %8 : vector<64x144xf32>
    %10 = vector.extract_strided_slice %2 {offsets = [0, 0], sizes = [16, 64], strides = [1, 1]} : vector<16x65xf32> to vector<16x64xf32>
    %cst_6 = arith.constant dense<0.000000e+00> : vector<16x144xf32>
    %11 = tpu.matmul %10, %9, %cst_6 {dimension_numbers = #tpu.dot_dimension_numbers<[1], [0], [0], [1], [0, 0, 1, 1], [], []>} : vector<16x64xf32>, vector<64x144xf32>, vector<16x144xf32> -> vector<16x144xf32>
    %12 = vector.extract_strided_slice %2 {offsets = [0, 64], sizes = [16, 1], strides = [1, 1]} : vector<16x65xf32> to vector<16x1xf32>
    %13 = vector.broadcast %12 : vector<16x1xf32> to vector<16x144xf32>
    %14 = arith.addf %11, %13 : vector<16x144xf32>
    %c0_7 = arith.constant 0 : index
    %c0_8 = arith.constant 0 : index
    %15 = vector.load %arg3[%c0_7, %c0_8] : memref<160x8xf32, #tpu.memory_space<vmem>>, vector<160x8xf32>
    %16 = vector.extract_strided_slice %15 {offsets = [0, 0], sizes = [144, 8], strides = [1, 1]} : vector<160x8xf32> to vector<144x8xf32>
    %cst_9 = arith.constant dense<0.000000e+00> : vector<16x8xf32>
    %17 = tpu.matmul %14, %16, %cst_9 {dimension_numbers = #tpu.dot_dimension_numbers<[1], [0], [0], [1], [0, 0, 1, 1], [], []>} : vector<16x144xf32>, vector<144x8xf32>, vector<16x8xf32> -> vector<16x8xf32>
    %18 = vector.extract_strided_slice %15 {offsets = [144, 0], sizes = [16, 8], strides = [1, 1]} : vector<160x8xf32> to vector<16x8xf32>
    %19 = arith.mulf %17, %18 : vector<16x8xf32>
    %c0_10 = arith.constant 0 : index
    %c0_11 = arith.constant 0 : index
    %20 = vector.load %arg4[%c0_10, %c0_11] : memref<2x16xf32, #tpu.memory_space<vmem>>, vector<2x16xf32>
    %cst_12 = arith.constant dense<0.000000e+00> : vector<2x8xf32>
    %21 = tpu.matmul %20, %19, %cst_12 {dimension_numbers = #tpu.dot_dimension_numbers<[1], [0], [0], [1], [0, 0, 1, 1], [], []>} : vector<2x16xf32>, vector<16x8xf32>, vector<2x8xf32> -> vector<2x8xf32>
    %c0_13 = arith.constant 0 : index
    %c0_14 = arith.constant 0 : index
    %22 = vector.load %arg5[%c0_13, %c0_14] : memref<2x8xf32, #tpu.memory_space<vmem>>, vector<2x8xf32>
    tpu.vector_store %arg5[%c0_13, %c0_14], %21 {strides = array<i32>} : memref<2x8xf32, #tpu.memory_space<vmem>>, vector<2x8xf32>,
    return
  }
}

</mosaic_0001>

<bundles_post_ra>
// kernel: tpu_custom_call.1
= control target key start
LH: loop header
LB: loop body
LE: loop exit
PB: predicated region body
PF: predicated region fallthrough
CT: control target
= control target key end

     0   :  { %vm73_vm0 = vcmask 64512   ;;  %v608_v3 = vmov 0.0   ;;  %v609_v4 = vmov 8   ;;  %s795_s0 = inlined_call_operand.vmem [shape: f32[8,144], index: 0, kind: input, shape index: {}]   ;;  %s796_s1 = inlined_call_operand.vmem [shape: f32[64,9], index: 1, kind: input, shape index: {}]   ;;  %s797_s2 = inlined_call_operand.vmem [shape: f32[16,65], index: 2, kind: input, shape index: {}]   ;;  %s798_s3 = inlined_call_operand.vmem [shape: f32[160,8], index: 3, kind: input, shape index: {}]   ;;  %s799_s4 = inlined_call_operand.vmem [shape: f32[2,16], index: 4, kind: input, shape index: {}]   ;;  %s800_s5 = inlined_call_operand.hbm [shape: f32[2,8], index: 5, kind: output, shape index: {}]  }
   0x1   :  { %v22_v0 = vld [vmem:[%s795_s0 + $0x8] sm:$0xff]  ;;  %v21_v1 = vld [vmem:[%s795_s0] sm:$0xff]  ;;  %154 = vmatprep.mubr.f32.mxu0 %v608_v3  ;;  %580 = vset.pattern.permute.xlu0 %v609_v4 }
   0x2   :  { %v23_v2 = vld [vmem:[%s796_s1] sm:$0xff]  ;;  %90 = vmatprep.subr.mxu0 %v22_v0 }
   0x3   :  { %91 = vmatpush1.msra.mxu0 %v21_v1  ;;  %35 = vperm.xlu0 %580, %v23_v2  }
   0x4   :  { %505 = vmatmul.mubr.msk.f32.vlgmr.msra.gmra.mrb[0].mxu0 %vm73_vm0, %v23_v2 }
   0x5   :  { %10 = vsyncpa [#allocation3], 0  ;;  %160 = vmatprep.mubr.f32.mxu0 %v608_v3  ;;  %v24_v5 = vld [vmem:[%s796_s1 + $0x8] sm:$0xff]  ;;  %v25_v6 = vld [vmem:[%s796_s1 + $0x10] sm:$0xff]  ;;  %581 = vset.pattern.permute.xlu1 %v609_v4  ;;  %v610_v16 = vmov 64   ;;  %v611_v20 = vmov 0.0|0.0  }
   0x6   :  { %45 = vperm.xlu1 %581, %v25_v6   ;;  %298 = vmatprep.mubr.f32.mxu1 %v608_v3  ;;  %v26_v7 = vld [vmem:[%s796_s1 + $0x18] sm:$0xff]  ;;  %v27_v8 = vld [vmem:[%s796_s1 + $0x20] sm:$0xff]  ;;  %v28_v9 = vld [vmem:[%s796_s1 + $0x28] sm:$0xff]  ;;  %vm229_vm1 = vcmask 523264   ;;  %vm331_vm2 = vcmask 130048   ;;  %vm612_vm3 = vmmov 0  }
   0x7   :  { %40 = vperm.xlu0 %580, %v24_v5   ;;  %v29_v10 = vld [vmem:[%s796_s1 + $0x30] sm:$0xff]  ;;  %v30_v11 = vld [vmem:[%s796_s1 + $0x38] sm:$0xff]  ;;  %v694_v12 = vld [vmem:[%s797_s2] sm:$0xff]  ;;  %544 = vmatprep.subr.bf16.mxu0 %v611_v20  ;;  %s613_s27 = smov [#allocation2]   ;;  %vm489_vm4 = vcmask 58368  }
   0x8   :  { %506 = vmatmul.mubr.msk.f32.gmra.mrb[2].mxu0 %vm73_vm0, %v24_v5  ;;  %v311_v13 = vld [vmem:[%s798_s3] sm:$0xff]  ;;  %v312_v14 = vld [vmem:[%s798_s3 + $0x8] sm:$0xff]  ;;  %v313_v18 = vld [vmem:[%s798_s3 + $0x10] sm:$0xff]  ;;  %s497_s28 = sshll.u32 %s613_s27, 4  ;;  %s498_s28 = int_to_ptr.vmem [resolvable:$true] %s497_s28 }
   0x9   :  { %166 = vmatprep.mubr.f32.mxu0 %v608_v3  ;;  %v705_v15 = vld [vmem:[%s797_s2 + $0x8] sm:$0xff]  ;;  %v545_v17 = vpack.c.bf16 %v312_v14, %v311_v13  ;;  %v314_v19 = vld [vmem:[%s798_s3 + $0x18] sm:$0xff]  ;;  %v315_v22 = vld [vmem:[%s798_s3 + $0x20] sm:$0xff]  ;;  %p589_p1 = scmp.lt.s32.totalorder %s498_s28, %s498_s28 }
   0xa   :  { %50 = vperm.xlu1 %581, %v26_v7   ;;  %v548_v21 = vpack.c.bf16 %v314_v19, %v313_v18  ;;  %v316_v23 = vld [vmem:[%s798_s3 + $0x28] sm:$0xff]  ;;  %v317_v25 = vld [vmem:[%s798_s3 + $0x30] sm:$0xff]  ;;  %v318_v26 = vld [vmem:[%s798_s3 + $0x38] sm:$0xff] }
   0xb   :  { %55 = vperm.xlu0 %580, %v27_v8   ;;  %546 = vmatpush1.bf16.msra.mxu0 %v545_v17  ;;  %v551_v24 = vpack.c.bf16 %v316_v23, %v315_v22  ;;  %v554_v27 = vpack.c.bf16 %v318_v26, %v317_v25  ;;  %v319_v28 = vld [vmem:[%s798_s3 + $0x40] sm:$0xff]  ;;  %v320_v29 = vld [vmem:[%s798_s3 + $0x48] sm:$0xff]  ;;  %v321_v31 = vld [vmem:[%s798_s3 + $0x50] sm:$0xff] }
   0xc   :  { %507 = vmatmul.mubr.msk.f32.gmra.mrb[4].mxu0 %vm73_vm0, %v25_v6  ;;  %547 = vmatprep.subr.bf16.mxu0 %v611_v20  ;;  %v557_v30 = vpack.c.bf16 %v320_v29, %v319_v28  ;;  %v322_v32 = vld [vmem:[%s798_s3 + $0x58] sm:$0xff]  ;;  %v323_v34 = vld [vmem:[%s798_s3 + $0x60] sm:$0xff]  ;;  %v324_v35 = vld [vmem:[%s798_s3 + $0x68] sm:$0xff] }
   0xd   :  { %172 = vmatprep.mubr.f32.mxu0 %v608_v3  ;;  %v560_v33 = vpack.c.bf16 %v322_v32, %v321_v31  ;;  %v563_v36 = vpack.c.bf16 %v324_v35, %v323_v34  ;;  %v325_v37 = vld [vmem:[%s798_s3 + $0x70] sm:$0xff]  ;;  %v326_v38 = vld [vmem:[%s798_s3 + $0x78] sm:$0xff] }
   0xe   :  { %60 = vperm.xlu1 %581, %v28_v9   ;;  %v566_v39 = vpack.c.bf16 %v326_v38, %v325_v37 }
   0xf   :  { %65 = vperm.xlu0 %580, %v29_v10   ;;  %549 = vmatpush1.bf16.msra.mxu0 %v548_v21 }
  0x10   :  { %508 = vmatmul.mubr.msk.f32.gmra.mrb[6].mxu0 %vm73_vm0, %v26_v7  ;;  %550 = vmatprep.subr.bf16.mxu0 %v611_v20 }
  0x11   :  { %178 = vmatprep.mubr.f32.mxu0 %v608_v3 }
  0x12   :  { %70 = vperm.xlu1 %581, %v30_v11  }
  0x13   :  { %582 = vset.pattern.permute.xlu0 %v610_v16  ;;  %552 = vmatpush1.bf16.msra.mxu0 %v551_v24 }
  0x14   :  { %509 = vmatmul.mubr.msk.f32.gmra.mrb[8].mxu0 %vm73_vm0, %v27_v8  ;;  %221 = vperm.xlu0 %582, %v694_v12  }
  0x15   :  { %184 = vmatprep.mubr.f32.mxu0 %v608_v3  ;;  %553 = vmatprep.subr.bf16.mxu0 %v611_v20 }
  0x16   :  { %583 = vset.pattern.permute.xlu1 %v610_v16 }
  0x17   :  { %226 = vperm.xlu1 %583, %v705_v15   ;;  %555 = vmatpush1.bf16.msra.mxu0 %v554_v27 }
  0x18   :  { %510 = vmatmul.mubr.msk.f32.gmra.mrb[10].mxu0 %vm73_vm0, %v28_v9  ;;  %556 = vmatprep.subr.bf16.mxu0 %v611_v20 }
  0x19   :  { %190 = vmatprep.mubr.f32.mxu0 %v608_v3 }
  0x1b   :  { %558 = vmatpush1.bf16.msra.mxu0 %v557_v30 }
  0x1c   :  { %511 = vmatmul.mubr.msk.f32.gmra.mrb[12].mxu0 %vm73_vm0, %v29_v10  ;;  %559 = vmatprep.subr.bf16.mxu0 %v611_v20 }
  0x1d   :  { %196 = vmatprep.mubr.f32.mxu0 %v608_v3 }
  0x1f   :  { %561 = vmatpush1.bf16.msra.mxu0 %v560_v33 }
  0x20   :  { %512 = vmatmul.mubr.msk.f32.gmra.mrb[14].mxu0 %vm73_vm0, %v30_v11  ;;  %562 = vmatprep.subr.bf16.mxu0 %v611_v20 }
  0x23   :  { %564 = vmatpush1.bf16.msra.mxu0 %v563_v36 }
  0x24   :  { %565 = vmatprep.subr.bf16.mxu0 %v611_v20 }
  0x27   :  { %567 = vmatpush1.bf16.msra.mxu0 %v566_v39 }
  0x28   :  { %568 = vmatprep.subr.bf16.mxu0 %v611_v20 }
  0x82   :  { %v36_v40 = vpop.permute.xlu0 %35 }
  0x85   :  { %v46_v49 = vpop.permute.xlu1 %45 }
  0x86   :  { %v41_v43 = vpop.permute.xlu0 %40 }
  0x89   :  { %v51_v60 = vpop.permute.xlu1 %50 }
  0x8a   :  { %v56_v10 = vpop.permute.xlu0 %55 }
  0x8d   :  { %v61_v14 = vpop.permute.xlu1 %60 }
  0x8e   :  { %v66_v29 = vpop.permute.xlu0 %65 }
  0x91   :  { %v71_v32 = vpop.permute.xlu1 %70 }
  0xd7   :  { %v156_v41 = vpop.f32.mrb[0].mxu0 }
  0xd8   :  { %v158_v42 = vpop.f32.mrb[1].mxu0  ;;  %v157_v44 = vadd.f32 %v156_v41, %v36_v40 }
  0xd9   :  { %v159_v45 = vadd.f32 %v158_v42, %v36_v40 }
  0xda   :  { %v203_v51 = vmax.f32 %v157_v44, 0.0  ;;  %v327_v44 = vld [vmem:[%s798_s3 + $0x80] sm:$0xff] }
  0xdb   :  { %v162_v46 = vpop.f32.mrb[2].mxu0  ;;  %v204_v53 = vmax.f32 %v159_v45, 0.0  ;;  %v328_v45 = vld [vmem:[%s798_s3 + $0x88] sm:$0xff] }
  0xdc   :  { %v163_v47 = vadd.f32 %v162_v46, %v41_v43  ;;  %v164_v48 = vpop.f32.mrb[3].mxu0  ;;  %v569_v46 = vpack.c.bf16 %v328_v45, %v327_v44 }
  0xdd   :  { %v165_v50 = vadd.f32 %v164_v48, %v41_v43 }
  0xde   :  { %v205_v52 = vmax.f32 %v163_v47, 0.0  ;;  %570 = vmatpush1.bf16.msra.mxu0 %v569_v46  ;;  %v222_v47 = vpop.permute.xlu0 %221 }
  0xdf   :  { %v206_v54 = vmax.f32 %v165_v50, 0.0  ;;  %v168_v55 = vpop.f32.mrb[4].mxu0  ;;  %v227_v50 = vpop.permute.xlu1 %226 }
  0xe0   :  { %v170_v56 = vpop.f32.mrb[5].mxu0  ;;  %v530_v57 = vpack.c.bf16 %v205_v52, %v203_v51  ;;  %v169_v59 = vadd.f32 %v168_v55, %v46_v49 }
  0xe1   :  { %v528_v58 = vpack.c.bf16 %v206_v54, %v204_v53  ;;  %v171_v61 = vadd.f32 %v170_v56, %v46_v49  ;;  %v329_v56 = vld [vmem:[%s798_s3 + $0x90] sm:$0xff] }
  0xe2   :  { %v207_v2 = vmax.f32 %v169_v59, 0.0 }
  0xe3   :  { %v174_v62 = vpop.f32.mrb[6].mxu0  ;;  %529 = vmatprep.subr.bf16.mxu1 %v528_v58  ;;  %v208_v5 = vmax.f32 %v171_v61, 0.0 }
  0xe4   :  { %v175_v63 = vadd.f32 %v174_v62, %v51_v60  ;;  %v176_v0 = vpop.f32.mrb[7].mxu0  ;;  %531 = vmatpush1.bf16.msra.mxu1 %v530_v57  ;;  %v330_v57 = vld [vmem:[%s798_s3 + $0x98] sm:$0xff]  ;;  %s584_s3 = scalar_lea.vmem %s498_s28, 32 }
  0xe5   :  { %v177_v1 = vadd.f32 %v176_v0, %v51_v60  ;;  %p585_p0 = scmp.ne.s32.totalorder %s498_s28, %s584_s3  ;;  %p590_p2 = scmp.lt.s32.totalorder %s584_s3, %s584_s3 }
  0xe6   :  { %v209_v4 = vmax.f32 %v175_v63, 0.0 }
  0xe7   :  { %v210_v6 = vmax.f32 %v177_v1, 0.0  ;;  %v180_v7 = vpop.f32.mrb[8].mxu0  ;;  %p591_p3 = por %p590_p2, %p589_p1 }
  0xe8   :  { %v534_v8 = vpack.c.bf16 %v209_v4, %v207_v2  ;;  %v182_v9 = vpop.f32.mrb[9].mxu0  ;;  %v181_v13 = vadd.f32 %v180_v7, %v56_v10 }
  0xe9   :  { %v532_v11 = vpack.c.bf16 %v210_v6, %v208_v5  ;;  %v183_v16 = vadd.f32 %v182_v9, %v56_v10  ;;  %p592_p4 = pnand %p591_p3, %p585_p0 }
  0xea   :  { %v211_v22 = vmax.f32 %v181_v13, 0.0 }
  0xeb   :  { %v186_v17 = vpop.f32.mrb[10].mxu0  ;;  %533 = vmatprep.subr.bf16.mxu1 %v532_v11  ;;  %v212_v24 = vmax.f32 %v183_v16, 0.0 }
  0xec   :  { %v187_v18 = vadd.f32 %v186_v17, %v61_v14  ;;  %v188_v19 = vpop.f32.mrb[11].mxu0  ;;  %535 = vmatpush1.bf16.msra.mxu1 %v534_v8 }
  0xed   :  { %v189_v21 = vadd.f32 %v188_v19, %v61_v14 }
  0xee   :  { %v213_v23 = vmax.f32 %v187_v18, 0.0 }
  0xef   :  { %v214_v25 = vmax.f32 %v189_v21, 0.0  ;;  %v192_v26 = vpop.f32.mrb[12].mxu0 }
  0xf0   :  { %v538_v27 = vpack.c.bf16 %v213_v23, %v211_v22  ;;  %v194_v28 = vpop.f32.mrb[13].mxu0  ;;  %v193_v31 = vadd.f32 %v192_v26, %v66_v29 }
  0xf1   :  { %v536_v30 = vpack.c.bf16 %v214_v25, %v212_v24  ;;  %v195_v33 = vadd.f32 %v194_v28, %v66_v29 }
  0xf2   :  { %v215_v38 = vmax.f32 %v193_v31, 0.0 }
  0xf3   :  { %v198_v34 = vpop.f32.mrb[14].mxu0  ;;  %537 = vmatprep.subr.bf16.mxu1 %v536_v30  ;;  %v216_v40 = vmax.f32 %v195_v33, 0.0 }
  0xf4   :  { %v199_v35 = vadd.f32 %v198_v34, %v71_v32  ;;  %v200_v36 = vpop.f32.mrb[15].mxu0  ;;  %539 = vmatpush1.bf16.msra.mxu1 %v538_v27 }
  0xf5   :  { %v201_v37 = vadd.f32 %v200_v36, %v71_v32 }
  0xf6   :  { %v217_v39 = vmax.f32 %v199_v35, 0.0 }
  0xf7   :  { %v218_v41 = vmax.f32 %v201_v37, 0.0 }
  0xf8   :  { %v542_v42 = vpack.c.bf16 %v217_v39, %v215_v38 }
  0xf9   :  { %v540_v43 = vpack.c.bf16 %v218_v41, %v216_v40 }
  0xfb   :  { %541 = vmatprep.subr.bf16.mxu1 %v540_v43 }
  0xfc   :  { %543 = vmatpush1.bf16.msra.mxu1 %v542_v42 }
  0xfd   :  { %571 = vmatprep.subr.bf16.mxu1 %v611_v20 }
  0xff   :  { %513 = vmatmul.mubr.msk.f32.vlgmr.msra.gmra.mrb[0].mxu1 %vm229_vm1, %v694_v12 }
 0x100   :  { %304 = vmatprep.mubr.f32.mxu1 %v608_v3 }
 0x103   :  { %514 = vmatmul.mubr.msk.f32.gmra.mrb[2].mxu1 %vm229_vm1, %v705_v15 }
 0x104   :  { %525 = vmatprep.mubr.msk.f32.mxu1 %vm612_vm3, %v608_v3  ;;  %v415_v3 = vld [vmem:[%s799_s4] sm:$0x3] }
 0x1d2   :  { %v300_v48 = vpop.f32.mrb[0].mxu1 }
 0x1d3   :  { %v302_v49 = vpop.f32.mrb[1].mxu1  ;;  %v301_v12 = vadd.f32 %v300_v48, %v222_v47 }
 0x1d4   :  { %v303_v20 = vadd.f32 %v302_v49, %v222_v47 }
 0x1d6   :  { %v306_v51 = vpop.f32.mrb[2].mxu1  ;;  %515 = vmatprep.mubr.msk.f32.mxu0 %vm331_vm2, %v303_v20 }
 0x1d7   :  { %v308_v15 = vpop.f32.mrb[3].mxu1  ;;  %403 = vmatmul.mubr.f32.vlgmr.msra.gmra.mrb[16].mxu0 %v301_v12  ;;  %v307_v53 = vadd.f32 %v306_v51, %v227_v50 }
 0x1d8   :  { %v309_v52 = vadd.f32 %v308_v15, %v227_v50 }
 0x1da   :  { %516 = vmatprep.mubr.msk.f32.mxu0 %vm331_vm2, %v309_v52 }
 0x1db   :  { %408 = vmatmul.mubr.f32.gmra.mrb[18].mxu0 %v307_v53 }
 0x2aa   :  { %v404_v54 = vpop.f32.mrb[16].mxu0 }
 0x2ab   :  { %v406_v55 = vpop.f32.mrb[17].mxu0  ;;  %v413_v59 = vmul.f32 %v404_v54, %v329_v56 }
 0x2ae   :  { %v409_v58 = vpop.f32.mrb[18].mxu0 }
 0x2af   :  { %v414_v60 = vmul.f32 %v409_v58, %v330_v57  ;;  %v411_v61 = vpop.f32.mrb[19].mxu0 }
 0x2b1   :  { %v572_v62 = vpack.c.bf16 %v414_v60, %v413_v59 }
 0x2b3   :  { %573 = vmatpush3.bf16.msra.mxu1 %v572_v62 }
 0x2b6   :  { %526 = vmatmul.mubr.msk.f32.vlgmr.msra.gmra.mrb[4].mxu1 %vm331_vm2, %v415_v3 }
 0x389   :  { %v485_v63 = vpop.f32.mrb[4].mxu1 }
 0x38a   :  { %490 = vst.msk [vmem:[#allocation2] sm:$0x3] %vm489_vm4, %v485_v63  ;;  %v527_v0 = vpop.f32.mrb[5].mxu1 }
 0x38b   :  { %595 = shalt.err (!%p592_p4)
}
 0x38c   :  { %s596_s4 = scalar_lea.hbm %s800_s5, 32 }
 0x38d   :  { %p597_p5 = scmp.ne.s32.totalorder %s800_s5, %s596_s4  ;;  %p600_p6 = scmp.lt.u32.totalorder %s596_s4, %s800_s5 }
 0x38f   :  { %p602_p7 = pnand %p600_p6, %p597_p5 }
 0x391   :  { %605 = shalt.err (!%p602_p7)
}
 0x392   :  { %500 = dma.vmem_to_hbm [thread:$0]  %s498_s28, 32, %s800_s5, [#allocation3]  }
 0x393   :  { %606 = dma.done.wait [#allocation3], 32  }
 0x394   :  { %607 = vsyncadd [#allocation3], 4294967264 }
 0x395   :  { %504 = vsyncpa [#allocation3], 1 }

</bundles_post_ra>
